<compile_context>
chip_gen: v7x
topology: tpu7x:2x2x1
jax: 0.10.0
libtpu: 0.0.40
codegen_flags: <defaults>
</compile_context>

<pallas_src>
import functools

import jax
import jax.numpy as jnp
from jax.experimental import pallas as pl
from jax.experimental.pallas import tpu as pltpu


def conv_layer_kernel(nbr_ref, verts_ref, feat_ref, wsup_ref, bsup_ref,
                      wctr_ref, bctr_ref, sdn_ref, summat_ref, out_ref,
                      tab_hi_ref, tab_lo_ref, *, V, TV, N, SOC):
    """Grid = (batch, vertex_tile).

    nbr_ref   : (1, TV, N)  int32   neighbor indices of this vertex tile
    verts_ref : (1, V, 3)   f32     full vertex table (resident per batch)
    feat_ref  : (1, V, IC)  f32     full feature table (resident per batch)
    wsup_ref  : (IC, SOC)   f32     support weights
    bsup_ref  : (1, SOC)    f32     support bias
    wctr_ref  : (IC, OCP)   f32     center weights, zero-padded to OCP lanes
    bctr_ref  : (1, OCP)    f32     center bias, zero-padded
    sdn_ref   : (3, SOC)    f32     pre-normalized support directions
    summat_ref: (SOC, OCP)  f32     block-ones matrix summing the S groups
    out_ref   : (1, TV, OCP) f32
    tab_*_ref : (V, 2*SOC+3) bf16   per-batch gather table (hi / lo split)
    """
    f32 = jnp.float32
    t = pl.program_id(1)

    # -------- per-batch gather table, built once per batch element ----------
    # columns: [ verts @ sdn (SOC) | feat @ Wsup + bsup (SOC) | verts (3) ]
    # stored as exact f32 = hi + lo bf16 split -> the gather matmul below runs
    # on the bf16 MXU path while reconstructing values to ~f32 accuracy.
    @pl.when(t == 0)
    def _build_table():
        verts = verts_ref[0]                                     # (V, 3)
        feat = feat_ref[0]                                       # (V, IC)
        sdn = sdn_ref[...]                                       # (3, SOC)
        # K == 3 contraction done as 3 broadcast FMAs on the VPU (no depth-3
        # MXU matmul).
        vproj = (verts[:, 0:1] * sdn[0:1, :]
                 + verts[:, 1:2] * sdn[1:2, :]
                 + verts[:, 2:3] * sdn[2:3, :])                  # (V, SOC)
        fsup = jnp.dot(feat, wsup_ref[...],
                       preferred_element_type=f32) + bsup_ref[...]   # (V, SOC)

        def put(seg, col0, width):
            hi = seg.astype(jnp.bfloat16)
            lo = (seg - hi.astype(f32)).astype(jnp.bfloat16)
            tab_hi_ref[:, col0:col0 + width] = hi
            tab_lo_ref[:, col0:col0 + width] = lo

        put(vproj, 0, SOC)
        put(fsup, SOC, SOC)
        put(verts, 2 * SOC, 3)

    # -------- per-vertex-tile compute ----------------------------------------
    v0 = pl.multiple_of(t * TV, TV)

    # Neighbor indices rearranged n-major into a (N*TV, 1) column by
    # concatenating N static lane-slices (no lane<->sublane reshape needed).
    idx_col = jnp.concatenate(
        [nbr_ref[0, :, n:n + 1] for n in range(N)], axis=0)      # (N*TV, 1)

    # One-hot gather matrix (0/1 values are exact in bf16).
    # TODO(synk): replace the one-hot matmul with a native dynamic row gather
    # if/when Mosaic exposes one; no clean Pallas TPU equivalent exists today.
    col = jax.lax.broadcasted_iota(jnp.int32, (N * TV, V), 1)
    onehot = (col == idx_col).astype(jnp.bfloat16)               # (N*TV, V)

    g = (jnp.dot(onehot, tab_hi_ref[...], preferred_element_type=f32)
         + jnp.dot(onehot, tab_lo_ref[...], preferred_element_type=f32))
    g = g.reshape(N, TV, 2 * SOC + 3)                            # gathered rows

    # Center values for this tile, reconstructed from the *same* hi/lo table so
    # that self-neighbors cancel exactly (d == 0  ->  theta == 0).
    ctr = (tab_hi_ref[pl.ds(v0, TV), :].astype(f32)
           + tab_lo_ref[pl.ds(v0, TV), :].astype(f32))           # (TV, CG)
    ctr_vproj = ctr[None, :, :SOC]                               # (1, TV, SOC)
    ctr_verts = ctr[None, :, 2 * SOC:]                           # (1, TV, 3)

    # theta = relu( (d @ sdn) / max(||d||, 1e-12) )  — matches F.normalize.
    d = g[:, :, 2 * SOC:] - ctr_verts                            # (N, TV, 3)
    inv_norm = jax.lax.rsqrt(jnp.maximum(
        jnp.sum(d * d, axis=-1, keepdims=True), 1e-24))          # (N, TV, 1)
    theta = jnp.maximum((g[:, :, :SOC] - ctr_vproj) * inv_norm, 0.0)
    act = theta * g[:, :, SOC:2 * SOC]                           # (N, TV, SOC)
    maxed = jnp.max(act, axis=0)                                 # (TV, SOC)

    # Sum the S support groups with a tiny block-ones MXU matmul; its output is
    # already lane-dense (OC padded to OCP), as is the padded center projection.
    pooled = jnp.dot(maxed, summat_ref[...], preferred_element_type=f32)
    feat_c = feat_ref[0, pl.ds(v0, TV), :]                       # (TV, IC)
    center = jnp.dot(feat_c, wctr_ref[...],
                     preferred_element_type=f32) + bctr_ref[...] # (TV, OCP)
    out_ref[0] = center + pooled


def _pick_tile_v(V):
    for tv in (128, 64, 32, 16, 8):
        if V % tv == 0:
            return tv
    return V


def conv_layer_pallas(neighbor_index, vertices, feature_map,
                      weights, bias, directions, *,
                      out_channel, support_num, tile_v=None):
    f32 = jnp.float32
    bs, V, N = neighbor_index.shape
    IC = feature_map.shape[-1]
    OC, S = out_channel, support_num
    SOC = S * OC
    OCP = ((OC + 127) // 128) * 128          # lane-dense (padded) output width
    TV = _pick_tile_v(V) if tile_v is None else tile_v
    assert V % TV == 0
    nT = V // TV
    CG = 2 * SOC + 3

    vertices = vertices.astype(f32)
    feature_map = feature_map.astype(f32)
    weights = weights.astype(f32)
    bias = bias.astype(f32)
    directions = directions.astype(f32)

    # ---- grid-invariant parameter prep, hoisted out of the kernel ----------
    sdn = directions / jnp.maximum(
        jnp.linalg.norm(directions, axis=0, keepdims=True), 1e-12)   # (3, SOC)
    w_center = jnp.zeros((IC, OCP), f32).at[:, :OC].set(weights[:, :OC])
    b_center = jnp.zeros((1, OCP), f32).at[:, :OC].set(bias[:OC][None, :])
    w_support = weights[:, OC:]                                      # (IC, SOC)
    b_support = bias[OC:][None, :]                                   # (1, SOC)
    rows = jnp.arange(SOC)
    sum_mat = jnp.zeros((SOC, OCP), f32).at[rows, rows % OC].set(1.0)

    nbr = neighbor_index.astype(jnp.int32)                           # (bs, V, N)

    kernel = functools.partial(conv_layer_kernel, V=V, TV=TV, N=N, SOC=SOC)

    out_padded = pl.pallas_call(
        kernel,
        out_shape=jax.ShapeDtypeStruct((bs, V, OCP), f32),
        grid=(bs, nT),
        in_specs=[
            pl.BlockSpec((1, TV, N), lambda b, t: (b, t, 0)),    # neighbor idx tile
            pl.BlockSpec((1, V, 3), lambda b, t: (b, 0, 0)),     # vertices (resident)
            pl.BlockSpec((1, V, IC), lambda b, t: (b, 0, 0)),    # features (resident)
            pl.BlockSpec((IC, SOC), lambda b, t: (0, 0)),        # support weights
            pl.BlockSpec((1, SOC), lambda b, t: (0, 0)),         # support bias
            pl.BlockSpec((IC, OCP), lambda b, t: (0, 0)),        # center weights (pad)
            pl.BlockSpec((1, OCP), lambda b, t: (0, 0)),         # center bias (pad)
            pl.BlockSpec((3, SOC), lambda b, t: (0, 0)),         # normalized dirs
            pl.BlockSpec((SOC, OCP), lambda b, t: (0, 0)),       # support-sum matrix
        ],
        out_specs=pl.BlockSpec((1, TV, OCP), lambda b, t: (b, t, 0)),
        scratch_shapes=[
            pltpu.VMEM((V, CG), jnp.bfloat16),   # gather table, hi bf16 part
            pltpu.VMEM((V, CG), jnp.bfloat16),   # gather table, lo bf16 part
        ],
        compiler_params=pltpu.CompilerParams(
            dimension_semantics=("parallel", "arbitrary"),
            vmem_limit_bytes=48 * 1024 * 1024),
    )(nbr, vertices, feature_map, w_support, b_support, w_center, b_center,
      sdn, sum_mat)

    return out_padded[..., :OC]


# ---------------- pure-JAX reference (for correctness check) ----------------
def conv_layer_ref(neighbor_index, vertices, feature_map,
                   weights, bias, directions, *, out_channel, support_num):
    bs, V, N = neighbor_index.shape
    OC, S = out_channel, support_num
    gather = jax.vmap(lambda t, i: t[i])  # (V,C), (V,N) -> (V,N,C)
    pos_nbr = gather(vertices, neighbor_index)                      # (bs,V,N,3)
    direc = pos_nbr - vertices[:, :, None, :]
    dnorm = jnp.linalg.norm(direc, axis=-1, keepdims=True)
    ndn = direc / jnp.maximum(dnorm, 1e-12)
    sdn = directions / jnp.maximum(
        jnp.linalg.norm(directions, axis=0, keepdims=True), 1e-12)
    theta = jax.nn.relu(jnp.einsum("bvnd,dc->bvnc", ndn, sdn))      # (bs,V,N,S*OC)
    feat_out = feature_map @ weights + bias                         # (bs,V,(S+1)*OC)
    fc = feat_out[:, :, :OC]
    fs = feat_out[:, :, OC:]
    fs_g = gather(fs, neighbor_index)                               # (bs,V,N,S*OC)
    act = (theta * fs_g).reshape(bs, V, N, S, OC)
    act = jnp.max(act, axis=2)
    act = jnp.sum(act, axis=2)
    return fc + act


if __name__ == "__main__":
    key = jax.random.PRNGKey(0)
    bs, V, N = 2, 16, 8
    in_channel, out_channel, support_num = 8, 16, 3
    C_total = (support_num + 1) * out_channel

    k1, k2, k3, k4, k5, k6 = jax.random.split(key, 6)

    # deterministic parameter init (matches PyTorch uniform(-stdv, stdv) shapes)
    stdv = 1.0 / (out_channel * (support_num + 1)) ** 0.5
    weights = jax.random.uniform(k1, (in_channel, C_total), jnp.float32, -stdv, stdv)
    bias = jax.random.uniform(k2, (C_total,), jnp.float32, -stdv, stdv)
    directions = jax.random.uniform(k3, (3, support_num * out_channel),
                                    jnp.float32, -stdv, stdv)

    # inputs
    neighbor_index = jax.random.randint(k4, (bs, V, N), 0, V, dtype=jnp.int32)
    vertices = jax.random.normal(k5, (bs, V, 3), jnp.float32)
    feature_map = jax.random.normal(k6, (bs, V, in_channel), jnp.float32)

    out = conv_layer_pallas(neighbor_index, vertices, feature_map,
                            weights, bias, directions,
                            out_channel=out_channel, support_num=support_num)
    out = jax.block_until_ready(out)

    ref = conv_layer_ref(neighbor_index, vertices, feature_map,
                         weights, bias, directions,
                         out_channel=out_channel, support_num=support_num)
    assert out.shape == (bs, V, out_channel)
    max_err = float(jnp.max(jnp.abs(out - ref)))
    # bf16 hi+lo table split keeps the gather at ~1e-5 relative accuracy.
    assert jnp.allclose(out, ref, rtol=2e-3, atol=2e-3), max_err

    print("KERNEL_OK")
</pallas_src>

<mosaic_0001>
module attributes {stable_mosaic.version = 11 : i64} {
  func.func @conv_layer_kernel(%arg0: i32, %arg1: i32, %arg2: memref<1x16x8xi32, #tpu.memory_space<vmem>>, %arg3: memref<1x16x3xf32, #tpu.memory_space<vmem>>, %arg4: memref<1x16x8xf32, #tpu.memory_space<vmem>>, %arg5: memref<8x48xf32, #tpu.memory_space<vmem>>, %arg6: memref<1x48xf32, #tpu.memory_space<vmem>>, %arg7: memref<8x128xf32, #tpu.memory_space<vmem>>, %arg8: memref<1x128xf32, #tpu.memory_space<vmem>>, %arg9: memref<3x48xf32, #tpu.memory_space<vmem>>, %arg10: memref<48x128xf32, #tpu.memory_space<vmem>>, %arg11: memref<1x16x128xf32, #tpu.memory_space<vmem>>, %arg12: memref<16x99xbf16, #tpu.memory_space<vmem>>, %arg13: memref<16x99xbf16, #tpu.memory_space<vmem>>) attributes {dimension_semantics = [#tpu.dimension_semantics<parallel>, #tpu.dimension_semantics<arbitrary>], iteration_bounds = array<i64: 2, 1>, scalar_prefetch = 0 : i64, scratch_operands = 2 : i64, tpu.core_type = #tpu.core_type<tc>, window_params = [{transform_indices = @transform_0, window_bounds = array<i64: 1, 16, 8>}, {transform_indices = @transform_1, window_bounds = array<i64: 1, 16, 3>}, {transform_indices = @transform_2, window_bounds = array<i64: 1, 16, 8>}, {pipeline_mode = #tpu.pipeline_mode<synchronous>, transform_indices = @transform_3, window_bounds = array<i64: 8, 48>}, {pipeline_mode = #tpu.pipeline_mode<synchronous>, transform_indices = @transform_4, window_bounds = array<i64: 1, 48>}, {pipeline_mode = #tpu.pipeline_mode<synchronous>, transform_indices = @transform_5, window_bounds = array<i64: 8, 128>}, {pipeline_mode = #tpu.pipeline_mode<synchronous>, transform_indices = @transform_6, window_bounds = array<i64: 1, 128>}, {pipeline_mode = #tpu.pipeline_mode<synchronous>, transform_indices = @transform_7, window_bounds = array<i64: 3, 48>}, {pipeline_mode = #tpu.pipeline_mode<synchronous>, transform_indices = @transform_8, window_bounds = array<i64: 48, 128>}, {transform_indices = @transform_9, window_bounds = array<i64: 1, 16, 128>}]} {
    %c0_i32 = arith.constant 0 : i32
    %0 = arith.cmpi eq, %arg1, %c0_i32 : i32
    %1 = arith.extui %0 : i1 to i32
    %c0_i32_0 = arith.constant 0 : i32
    %2 = arith.cmpi ne, %1, %c0_i32_0 : i32
    scf.if %2 {
      %c0_41 = arith.constant 0 : index
      %c0_42 = arith.constant 0 : index
      %c0_43 = arith.constant 0 : index
      %78 = vector.load %arg3[%c0_41, %c0_42, %c0_43] : memref<1x16x3xf32, #tpu.memory_space<vmem>>, vector<1x16x3xf32>
      %79 = vector.shape_cast %78 : vector<1x16x3xf32> to vector<16x3xf32>
      %c0_44 = arith.constant 0 : index
      %c0_45 = arith.constant 0 : index
      %c0_46 = arith.constant 0 : index
      %80 = vector.load %arg4[%c0_44, %c0_45, %c0_46] : memref<1x16x8xf32, #tpu.memory_space<vmem>>, vector<1x16x8xf32>
      %81 = vector.shape_cast %80 : vector<1x16x8xf32> to vector<16x8xf32>
      %c0_47 = arith.constant 0 : index
      %c0_48 = arith.constant 0 : index
      %82 = vector.load %arg9[%c0_47, %c0_48] : memref<3x48xf32, #tpu.memory_space<vmem>>, vector<3x48xf32>
      %83 = vector.extract_strided_slice %79 {offsets = [0, 0], sizes = [16, 1], strides = [1, 1]} : vector<16x3xf32> to vector<16x1xf32>
      %84 = vector.extract_strided_slice %82 {offsets = [0, 0], sizes = [1, 48], strides = [1, 1]} : vector<3x48xf32> to vector<1x48xf32>
      %85 = vector.broadcast %83 : vector<16x1xf32> to vector<16x48xf32>
      %86 = vector.broadcast %84 : vector<1x48xf32> to vector<16x48xf32>
      %87 = arith.mulf %85, %86 : vector<16x48xf32>
      %88 = vector.extract_strided_slice %79 {offsets = [0, 1], sizes = [16, 1], strides = [1, 1]} : vector<16x3xf32> to vector<16x1xf32>
      %89 = vector.extract_strided_slice %82 {offsets = [1, 0], sizes = [1, 48], strides = [1, 1]} : vector<3x48xf32> to vector<1x48xf32>
      %90 = vector.broadcast %88 : vector<16x1xf32> to vector<16x48xf32>
      %91 = vector.broadcast %89 : vector<1x48xf32> to vector<16x48xf32>
      %92 = arith.mulf %90, %91 : vector<16x48xf32>
      %93 = arith.addf %87, %92 : vector<16x48xf32>
      %94 = vector.extract_strided_slice %79 {offsets = [0, 2], sizes = [16, 1], strides = [1, 1]} : vector<16x3xf32> to vector<16x1xf32>
      %95 = vector.extract_strided_slice %82 {offsets = [2, 0], sizes = [1, 48], strides = [1, 1]} : vector<3x48xf32> to vector<1x48xf32>
      %96 = vector.broadcast %94 : vector<16x1xf32> to vector<16x48xf32>
      %97 = vector.broadcast %95 : vector<1x48xf32> to vector<16x48xf32>
      %98 = arith.mulf %96, %97 : vector<16x48xf32>
      %99 = arith.addf %93, %98 : vector<16x48xf32>
      %c0_49 = arith.constant 0 : index
      %c0_50 = arith.constant 0 : index
      %100 = vector.load %arg5[%c0_49, %c0_50] : memref<8x48xf32, #tpu.memory_space<vmem>>, vector<8x48xf32>
      %cst_51 = arith.constant dense<0.000000e+00> : vector<16x48xf32>
      %101 = tpu.matmul %81, %100, %cst_51 {dimension_numbers = #tpu.dot_dimension_numbers<[1], [0], [0], [1], [0, 0, 1, 1], [], []>} : vector<16x8xf32>, vector<8x48xf32>, vector<16x48xf32> -> vector<16x48xf32>
      %c0_52 = arith.constant 0 : index
      %c0_53 = arith.constant 0 : index
      %102 = vector.load %arg6[%c0_52, %c0_53] : memref<1x48xf32, #tpu.memory_space<vmem>>, vector<1x48xf32>
      %103 = vector.broadcast %102 : vector<1x48xf32> to vector<16x48xf32>
      %104 = arith.addf %101, %103 : vector<16x48xf32>
      %105 = arith.truncf %99 : vector<16x48xf32> to vector<16x48xbf16>
      %106 = arith.extf %105 : vector<16x48xbf16> to vector<16x48xf32>
      %107 = arith.subf %99, %106 : vector<16x48xf32>
      %108 = arith.truncf %107 : vector<16x48xf32> to vector<16x48xbf16>
      %c0_54 = arith.constant 0 : index
      %c0_55 = arith.constant 0 : index
      %109 = vector.load %arg12[%c0_54, %c0_55] : memref<16x99xbf16, #tpu.memory_space<vmem>>, vector<16x48xbf16>
      tpu.vector_store %arg12[%c0_54, %c0_55], %105 {strides = array<i32>} : memref<16x99xbf16, #tpu.memory_space<vmem>>, vector<16x48xbf16>,
      %c0_56 = arith.constant 0 : index
      %c0_57 = arith.constant 0 : index
      %110 = vector.load %arg13[%c0_56, %c0_57] : memref<16x99xbf16, #tpu.memory_space<vmem>>, vector<16x48xbf16>
      tpu.vector_store %arg13[%c0_56, %c0_57], %108 {strides = array<i32>} : memref<16x99xbf16, #tpu.memory_space<vmem>>, vector<16x48xbf16>,
      %111 = arith.truncf %104 : vector<16x48xf32> to vector<16x48xbf16>
      %112 = arith.extf %111 : vector<16x48xbf16> to vector<16x48xf32>
      %113 = arith.subf %104, %112 : vector<16x48xf32>
      %114 = arith.truncf %113 : vector<16x48xf32> to vector<16x48xbf16>
      %c0_58 = arith.constant 0 : index
      %c48 = arith.constant 48 : index
      %115 = vector.load %arg12[%c0_58, %c48] : memref<16x99xbf16, #tpu.memory_space<vmem>>, vector<16x48xbf16>
      tpu.vector_store %arg12[%c0_58, %c48], %111 {strides = array<i32>} : memref<16x99xbf16, #tpu.memory_space<vmem>>, vector<16x48xbf16>,
      %c0_59 = arith.constant 0 : index
      %c48_60 = arith.constant 48 : index
      %116 = vector.load %arg13[%c0_59, %c48_60] : memref<16x99xbf16, #tpu.memory_space<vmem>>, vector<16x48xbf16>
      tpu.vector_store %arg13[%c0_59, %c48_60], %114 {strides = array<i32>} : memref<16x99xbf16, #tpu.memory_space<vmem>>, vector<16x48xbf16>,
      %117 = arith.truncf %79 : vector<16x3xf32> to vector<16x3xbf16>
      %118 = arith.extf %117 : vector<16x3xbf16> to vector<16x3xf32>
      %119 = arith.subf %79, %118 : vector<16x3xf32>
      %120 = arith.truncf %119 : vector<16x3xf32> to vector<16x3xbf16>
      %c0_61 = arith.constant 0 : index
      %c96 = arith.constant 96 : index
      %121 = vector.load %arg12[%c0_61, %c96] : memref<16x99xbf16, #tpu.memory_space<vmem>>, vector<16x3xbf16>
      tpu.vector_store %arg12[%c0_61, %c96], %117 {strides = array<i32>} : memref<16x99xbf16, #tpu.memory_space<vmem>>, vector<16x3xbf16>,
      %c0_62 = arith.constant 0 : index
      %c96_63 = arith.constant 96 : index
      %122 = vector.load %arg13[%c0_62, %c96_63] : memref<16x99xbf16, #tpu.memory_space<vmem>>, vector<16x3xbf16>
      tpu.vector_store %arg13[%c0_62, %c96_63], %120 {strides = array<i32>} : memref<16x99xbf16, #tpu.memory_space<vmem>>, vector<16x3xbf16>,
    } else {
    }
    %c16_i32 = arith.constant 16 : i32
    %3 = arith.muli %arg1, %c16_i32 : i32
    %4 = tpu.assume_multiple %3, 16 : i32
    %c0 = arith.constant 0 : index
    %c0_1 = arith.constant 0 : index
    %c0_2 = arith.constant 0 : index
    %5 = vector.load %arg2[%c0, %c0_1, %c0_2] : memref<1x16x8xi32, #tpu.memory_space<vmem>>, vector<1x16x1xi32>
    %6 = vector.shape_cast %5 : vector<1x16x1xi32> to vector<16x1xi32>
    %c0_3 = arith.constant 0 : index
    %c0_4 = arith.constant 0 : index
    %c1 = arith.constant 1 : index
    %7 = vector.load %arg2[%c0_3, %c0_4, %c1] : memref<1x16x8xi32, #tpu.memory_space<vmem>>, vector<1x16x1xi32>
    %8 = vector.shape_cast %7 : vector<1x16x1xi32> to vector<16x1xi32>
    %c0_5 = arith.constant 0 : index
    %c0_6 = arith.constant 0 : index
    %c2 = arith.constant 2 : index
    %9 = vector.load %arg2[%c0_5, %c0_6, %c2] : memref<1x16x8xi32, #tpu.memory_space<vmem>>, vector<1x16x1xi32>
    %10 = vector.shape_cast %9 : vector<1x16x1xi32> to vector<16x1xi32>
    %c0_7 = arith.constant 0 : index
    %c0_8 = arith.constant 0 : index
    %c3 = arith.constant 3 : index
    %11 = vector.load %arg2[%c0_7, %c0_8, %c3] : memref<1x16x8xi32, #tpu.memory_space<vmem>>, vector<1x16x1xi32>
    %12 = vector.shape_cast %11 : vector<1x16x1xi32> to vector<16x1xi32>
    %c0_9 = arith.constant 0 : index
    %c0_10 = arith.constant 0 : index
    %c4 = arith.constant 4 : index
    %13 = vector.load %arg2[%c0_9, %c0_10, %c4] : memref<1x16x8xi32, #tpu.memory_space<vmem>>, vector<1x16x1xi32>
    %14 = vector.shape_cast %13 : vector<1x16x1xi32> to vector<16x1xi32>
    %c0_11 = arith.constant 0 : index
    %c0_12 = arith.constant 0 : index
    %c5 = arith.constant 5 : index
    %15 = vector.load %arg2[%c0_11, %c0_12, %c5] : memref<1x16x8xi32, #tpu.memory_space<vmem>>, vector<1x16x1xi32>
    %16 = vector.shape_cast %15 : vector<1x16x1xi32> to vector<16x1xi32>
    %c0_13 = arith.constant 0 : index
    %c0_14 = arith.constant 0 : index
    %c6 = arith.constant 6 : index
    %17 = vector.load %arg2[%c0_13, %c0_14, %c6] : memref<1x16x8xi32, #tpu.memory_space<vmem>>, vector<1x16x1xi32>
    %18 = vector.shape_cast %17 : vector<1x16x1xi32> to vector<16x1xi32>
    %c0_15 = arith.constant 0 : index
    %c0_16 = arith.constant 0 : index
    %c7 = arith.constant 7 : index
    %19 = vector.load %arg2[%c0_15, %c0_16, %c7] : memref<1x16x8xi32, #tpu.memory_space<vmem>>, vector<1x16x1xi32>
    %20 = vector.shape_cast %19 : vector<1x16x1xi32> to vector<16x1xi32>
    %21 = tpu.concatenate %6, %8, %10, %12, %14, %16, %18, %20 in 0 : vector<16x1xi32>, vector<16x1xi32>, vector<16x1xi32>, vector<16x1xi32>, vector<16x1xi32>, vector<16x1xi32>, vector<16x1xi32>, vector<16x1xi32> -> vector<128x1xi32>
    %22 = tpu.iota {dimensions = array<i32: 1>} : vector<128x16xi32>
    %23 = vector.broadcast %21 : vector<128x1xi32> to vector<128x16xi32>
    %24 = arith.cmpi eq, %22, %23 : vector<128x16xi32>
    %25 = arith.extui %24 : vector<128x16xi1> to vector<128x16xi32>
    %26 = arith.sitofp %25 : vector<128x16xi32> to vector<128x16xf32>
    %27 = arith.truncf %26 : vector<128x16xf32> to vector<128x16xbf16>
    %c0_17 = arith.constant 0 : index
    %c0_18 = arith.constant 0 : index
    %28 = vector.load %arg12[%c0_17, %c0_18] : memref<16x99xbf16, #tpu.memory_space<vmem>>, vector<16x99xbf16>
    %cst = arith.constant dense<0.000000e+00> : vector<128x99xf32>
    %29 = tpu.matmul %27, %28, %cst {dimension_numbers = #tpu.dot_dimension_numbers<[1], [0], [0], [1], [0, 0, 1, 1], [], []>} : vector<128x16xbf16>, vector<16x99xbf16>, vector<128x99xf32> -> vector<128x99xf32>
    %c0_19 = arith.constant 0 : index
    %c0_20 = arith.constant 0 : index
    %30 = vector.load %arg13[%c0_19, %c0_20] : memref<16x99xbf16, #tpu.memory_space<vmem>>, vector<16x99xbf16>
    %cst_21 = arith.constant dense<0.000000e+00> : vector<128x99xf32>
    %31 = tpu.matmul %27, %30, %cst_21 {dimension_numbers = #tpu.dot_dimension_numbers<[1], [0], [0], [1], [0, 0, 1, 1], [], []>} : vector<128x16xbf16>, vector<16x99xbf16>, vector<128x99xf32> -> vector<128x99xf32>
    %32 = arith.addf %29, %31 : vector<128x99xf32>
    %33 = vector.shape_cast %32 : vector<128x99xf32> to vector<8x16x99xf32>
    %34 = arith.index_cast %4 : i32 to index
    %c0_22 = arith.constant 0 : index
    %35 = vector.load %arg12[%34, %c0_22] : memref<16x99xbf16, #tpu.memory_space<vmem>>, vector<16x99xbf16>
    %36 = arith.extf %35 : vector<16x99xbf16> to vector<16x99xf32>
    %37 = arith.index_cast %4 : i32 to index
    %c0_23 = arith.constant 0 : index
    %38 = vector.load %arg13[%37, %c0_23] : memref<16x99xbf16, #tpu.memory_space<vmem>>, vector<16x99xbf16>
    %39 = arith.extf %38 : vector<16x99xbf16> to vector<16x99xf32>
    %40 = arith.addf %36, %39 : vector<16x99xf32>
    %41 = vector.extract_strided_slice %40 {offsets = [0, 0], sizes = [16, 48], strides = [1, 1]} : vector<16x99xf32> to vector<16x48xf32>
    %42 = vector.shape_cast %41 : vector<16x48xf32> to vector<1x16x48xf32>
    %43 = vector.extract_strided_slice %40 {offsets = [0, 96], sizes = [16, 3], strides = [1, 1]} : vector<16x99xf32> to vector<16x3xf32>
    %44 = vector.shape_cast %43 : vector<16x3xf32> to vector<1x16x3xf32>
    %45 = vector.extract_strided_slice %33 {offsets = [0, 0, 96], sizes = [8, 16, 3], strides = [1, 1, 1]} : vector<8x16x99xf32> to vector<8x16x3xf32>
    %46 = vector.broadcast %44 : vector<1x16x3xf32> to vector<8x16x3xf32>
    %47 = arith.subf %45, %46 : vector<8x16x3xf32>
    %48 = arith.mulf %47, %47 : vector<8x16x3xf32>
    %cst_24 = arith.constant dense<0.000000e+00> : vector<8x16xf32>
    %49 = vector.multi_reduction <add>, %48, %cst_24 [2] : vector<8x16x3xf32> to vector<8x16xf32>
    %50 = vector.shape_cast %49 : vector<8x16xf32> to vector<8x16x1xf32>
    %cst_25 = arith.constant 1.000000e-24 : f32
    %51 = vector.broadcast %cst_25 : f32 to vector<8x16x1xf32>
    %52 = arith.maximumf %50, %51 : vector<8x16x1xf32>
    %53 = math.rsqrt %52 : vector<8x16x1xf32>
    %54 = vector.extract_strided_slice %33 {offsets = [0, 0, 0], sizes = [8, 16, 48], strides = [1, 1, 1]} : vector<8x16x99xf32> to vector<8x16x48xf32>
    %55 = vector.broadcast %42 : vector<1x16x48xf32> to vector<8x16x48xf32>
    %56 = arith.subf %54, %55 : vector<8x16x48xf32>
    %57 = vector.broadcast %53 : vector<8x16x1xf32> to vector<8x16x48xf32>
    %58 = arith.mulf %56, %57 : vector<8x16x48xf32>
    %cst_26 = arith.constant 0.000000e+00 : f32
    %59 = vector.broadcast %cst_26 : f32 to vector<8x16x48xf32>
    %60 = arith.maximumf %58, %59 : vector<8x16x48xf32>
    %61 = vector.extract_strided_slice %33 {offsets = [0, 0, 48], sizes = [8, 16, 48], strides = [1, 1, 1]} : vector<8x16x99xf32> to vector<8x16x48xf32>
    %62 = arith.mulf %60, %61 : vector<8x16x48xf32>
    %cst_27 = arith.constant dense<0xFF800000> : vector<16x48xf32>
    %63 = vector.multi_reduction <maximumf>, %62, %cst_27 [0] : vector<8x16x48xf32> to vector<16x48xf32>
    %c0_28 = arith.constant 0 : index
    %c0_29 = arith.constant 0 : index
    %64 = vector.load %arg10[%c0_28, %c0_29] : memref<48x128xf32, #tpu.memory_space<vmem>>, vector<48x128xf32>
    %cst_30 = arith.constant dense<0.000000e+00> : vector<16x128xf32>
    %65 = tpu.matmul %63, %64, %cst_30 {dimension_numbers = #tpu.dot_dimension_numbers<[1], [0], [0], [1], [0, 0, 1, 1], [], []>} : vector<16x48xf32>, vector<48x128xf32>, vector<16x128xf32> -> vector<16x128xf32>
    %c0_31 = arith.constant 0 : index
    %66 = arith.index_cast %4 : i32 to index
    %c0_32 = arith.constant 0 : index
    %67 = vector.load %arg4[%c0_31, %66, %c0_32] : memref<1x16x8xf32, #tpu.memory_space<vmem>>, vector<1x16x8xf32>
    %68 = vector.shape_cast %67 : vector<1x16x8xf32> to vector<16x8xf32>
    %c0_33 = arith.constant 0 : index
    %c0_34 = arith.constant 0 : index
    %69 = vector.load %arg7[%c0_33, %c0_34] : memref<8x128xf32, #tpu.memory_space<vmem>>, vector<8x128xf32>
    %cst_35 = arith.constant dense<0.000000e+00> : vector<16x128xf32>
    %70 = tpu.matmul %68, %69, %cst_35 {dimension_numbers = #tpu.dot_dimension_numbers<[1], [0], [0], [1], [0, 0, 1, 1], [], []>} : vector<16x8xf32>, vector<8x128xf32>, vector<16x128xf32> -> vector<16x128xf32>
    %c0_36 = arith.constant 0 : index
    %c0_37 = arith.constant 0 : index
    %71 = vector.load %arg8[%c0_36, %c0_37] : memref<1x128xf32, #tpu.memory_space<vmem>>, vector<1x128xf32>
    %72 = vector.broadcast %71 : vector<1x128xf32> to vector<16x128xf32>
    %73 = arith.addf %70, %72 : vector<16x128xf32>
    %74 = arith.addf %73, %65 : vector<16x128xf32>
    %c0_38 = arith.constant 0 : index
    %c0_39 = arith.constant 0 : index
    %c0_40 = arith.constant 0 : index
    %75 = vector.load %arg11[%c0_38, %c0_39, %c0_40] : memref<1x16x128xf32, #tpu.memory_space<vmem>>, vector<1x16x128xf32>
    %76 = vector.shape_cast %75 : vector<1x16x128xf32> to vector<16x128xf32>
    %77 = vector.shape_cast %74 : vector<16x128xf32> to vector<1x16x128xf32>
    tpu.vector_store %arg11[%c0_38, %c0_39, %c0_40], %77 {strides = array<i32>} : memref<1x16x128xf32, #tpu.memory_space<vmem>>, vector<1x16x128xf32>,
    return
  }
  func.func @transform_0(%arg0: i32, %arg1: i32) -> (i32, i32, i32) {
    %c0_i32 = arith.constant 0 : i32
    %c0_i32_0 = arith.constant 0 : i32
    return %arg0, %arg1, %c0_i32 : i32, i32, i32
  }
  func.func @transform_1(%arg0: i32, %arg1: i32) -> (i32, i32, i32) {
    %c0_i32 = arith.constant 0 : i32
    %c0_i32_0 = arith.constant 0 : i32
    %c0_i32_1 = arith.constant 0 : i32
    return %arg0, %c0_i32, %c0_i32_0 : i32, i32, i32
  }
  func.func @transform_2(%arg0: i32, %arg1: i32) -> (i32, i32, i32) {
    %c0_i32 = arith.constant 0 : i32
    %c0_i32_0 = arith.constant 0 : i32
    %c0_i32_1 = arith.constant 0 : i32
    return %arg0, %c0_i32, %c0_i32_0 : i32, i32, i32
  }
  func.func @transform_3(%arg0: i32, %arg1: i32) -> (i32, i32) {
    %c0_i32 = arith.constant 0 : i32
    %c0_i32_0 = arith.constant 0 : i32
    %c0_i32_1 = arith.constant 0 : i32
    return %c0_i32, %c0_i32_0 : i32, i32
  }
  func.func @transform_4(%arg0: i32, %arg1: i32) -> (i32, i32) {
    %c0_i32 = arith.constant 0 : i32
    %c0_i32_0 = arith.constant 0 : i32
    %c0_i32_1 = arith.constant 0 : i32
    return %c0_i32, %c0_i32_0 : i32, i32
  }
  func.func @transform_5(%arg0: i32, %arg1: i32) -> (i32, i32) {
    %c0_i32 = arith.constant 0 : i32
    %c0_i32_0 = arith.constant 0 : i32
    %c0_i32_1 = arith.constant 0 : i32
    return %c0_i32, %c0_i32_0 : i32, i32
  }
  func.func @transform_6(%arg0: i32, %arg1: i32) -> (i32, i32) {
    %c0_i32 = arith.constant 0 : i32
    %c0_i32_0 = arith.constant 0 : i32
    %c0_i32_1 = arith.constant 0 : i32
    return %c0_i32, %c0_i32_0 : i32, i32
  }
  func.func @transform_7(%arg0: i32, %arg1: i32) -> (i32, i32) {
    %c0_i32 = arith.constant 0 : i32
    %c0_i32_0 = arith.constant 0 : i32
    %c0_i32_1 = arith.constant 0 : i32
    return %c0_i32, %c0_i32_0 : i32, i32
  }
  func.func @transform_8(%arg0: i32, %arg1: i32) -> (i32, i32) {
    %c0_i32 = arith.constant 0 : i32
    %c0_i32_0 = arith.constant 0 : i32
    %c0_i32_1 = arith.constant 0 : i32
    return %c0_i32, %c0_i32_0 : i32, i32
  }
  func.func @transform_9(%arg0: i32, %arg1: i32) -> (i32, i32, i32) {
    %c0_i32 = arith.constant 0 : i32
    %c0_i32_0 = arith.constant 0 : i32
    return %arg0, %arg1, %c0_i32 : i32, i32, i32
  }
}

</mosaic_0001>

<bundles_post_ra>
// kernel: tpu_custom_call.1
= control target key start
LH: loop header
LB: loop body
LE: loop exit
PB: predicated region body
PF: predicated region fallthrough
CT: control target
= control target key end

     0   :  { %14 = vsyncpa [#allocation5], 0  ;;  %s2524_s0 = inlined_call_operand.vmem [shape: s32[2,16,8], index: 0, kind: input, shape index: {}]   ;;  %s2525_s1 = inlined_call_operand.vmem [shape: f32[2,16,3], index: 1, kind: input, shape index: {}]   ;;  %s2526_s2 = inlined_call_operand.vmem [shape: f32[2,16,8], index: 2, kind: input, shape index: {}]   ;;  %s2527_s3 = inlined_call_operand.vmem [shape: f32[8,48], index: 3, kind: input, shape index: {}]   ;;  %s2528_s4 = inlined_call_operand.vmem [shape: f32[1,48], index: 4, kind: input, shape index: {}]   ;;  %s2529_s5 = inlined_call_operand.vmem [shape: f32[8,128], index: 5, kind: input, shape index: {}]   ;;  %s2530_s6 = inlined_call_operand.vmem [shape: f32[1,128], index: 6, kind: input, shape index: {}]   ;;  %s2531_s7 = inlined_call_operand.vmem [shape: f32[3,48], index: 7, kind: input, shape index: {}]   ;;  %s2532_s8 = inlined_call_operand.vmem [shape: f32[48,128], index: 8, kind: input, shape index: {}]   ;;  %s2533_s9 = inlined_call_operand.hbm [shape: f32[2,16,128], index: 9, kind: output, shape index: {}]  }
   0x1   :  { %16 = vsyncpa [#allocation5 + $0x1], 0  ;;  %s2041_s30 = smov 0   ;;  %s2043_s10 = smov 0  }
   0x2   :  { %s2045_s11 = smov 0   ;;  %s2047_s12 = smov 0  }
   0x3   :  { %s2049_s13 = smov 0   ;;  %s2051_s14 = smov 0  }
   0x4 LB: > { %s1594_s15 = sadd.s32 4294967295, %s1971_s14   ;;  %s1595_s16 = sadd.s32 4294967294, %s1971_s14   ;;  %s1971_s14 = sphi %s2051_s14, %s22_s14   ;;  %s1967_s13 = sphi %s2049_s13, %s2540_s13   ;;  %s1963_s12 = sphi %s2047_s12, %s2539_s12   ;;  %s1959_s11 = sphi %s2045_s11, %s2538_s11   ;;  %s1955_s10 = sphi %s2043_s10, %s2537_s10   ;;  %s1951_s30 = sphi %s2041_s30, %s2536_s30  }
   0x5   : > { %s34_s17 = sadd.s32 1, %s1967_s13  ;;  %s249_s18 = sadd.s32 1, %s1959_s11 }
   0x6   : > { %p36_p0 = scmp.ge.s32.totalorder %s34_s17, 2  ;;  %p259_p1 = scmp.ne.s32.totalorder %s1959_s11, %s1955_s10 }
   0x7   : > { %p260_p2 = scmp.eq.s32.totalorder %s1594_s15, 1  ;;  %p265_p3 = scmp.ne.s32.totalorder %s1955_s10, %s1951_s30 }
   0x8   : > { %s2542_s17 = smov (%p36_p0, %s34_s17), 0  ;;  %p266_p5 = scmp.eq.s32.totalorder %s1595_s16, 1 }
   0x9   : > { %p2081_p4 = por %p260_p2, %p259_p1  ;;  %s244_s20 = ssub.s32 %s1967_s13, %s2542_s17 }
   0xa   : > { %p1598_p6 = scmp.ge.s32.totalorder %s1971_s14, 1  ;;  %p247_p7 = scmp.eq.s32.totalorder %s244_s20, 0 }
   0xb   : > { %p2088_p8 = por %p266_p5, %p265_p3  ;;  %p331_p9 = scmp.lt.s32.totalorder %s1971_s14, 3 }
   0xc   : > { %s2094_s22 = scalar_select %p247_p7, %s1959_s11, %s249_s18  }
   0xd   : > { %p332_p10 = pnand %p1598_p6, %p331_p9 }
   0xe   : > { %v460_v0 = vld [vmem:[%s2527_s3] sm:$0xff] (!%p332_p10)  ;;  %p382_p11 = scmp.lt.s32.totalorder (!%p332_p10), %s1963_s12, 1  ;;  %v1973_v1 = vmov (!%p332_p10), 0   ;;  %vm468_vm0 = vcmask (!%p332_p10), 64512   ;;  %s1974_s20 = smov (!%p332_p10), 122   ;;  %v1981_v9 = vmov (!%p332_p10), 1   ;;  %v422_v28 = vlaneseq (!%p332_p10) }
   0xf   : > { %335 = sbr.rel (%p332_p10) target bundleno = 1174 (0x496), region = 56  ;;  %1687 = vmatprep.subr.mxu0 (!%p332_p10), %v460_v0  ;;  %1855 = vset.pattern.permute.xlu1 (!%p332_p10), %v1973_v1  ;;  %s1975_s23 = smov (!%p332_p10), 121   ;;  %v1982_v12 = vmov (!%p332_p10), 2   ;;  %v411_v34 = vld [vmem:[%s2531_s7] sm:$0x7] (!%p332_p10)  ;;  %vm556_vm1 = vcmask (!%p332_p10), 392192  }
  0x10   : > { %1688 = vmatpush3.msra.mxu0 (!%p332_p10), %v460_v0  ;;  %1854 = vset.pattern.permute.xlu0 (!%p332_p10), %v1973_v1  ;;  %s1976_s24 = smov (!%p332_p10), 127   ;;  %s1978_s27 = smov (!%p332_p10), 125   ;;  %v423_v29 = vshrl.u32 (!%p332_p10), %v422_v28, 7  ;;  %v1606_v61 = vld [vmem:[%s2528_s4] ss:$0 sm:$0xff] (!%p332_p10)  ;;  %vm732_vm4 = vcmask (!%p332_p10), 130048  }
  0x11   : > { %s1979_s28 = smov (!%p332_p10), 124   ;;  %vm569_vm5 = vcmask (!%p332_p10), 785792   ;;  %vm586_vm6 = vcmask (!%p332_p10), 810752   ;;  %s1987_s15 = smov (!%p332_p10), 32  }
  0x12   : > { %v424_v32 = vsub.s32 (!%p332_p10), 0, %v423_v29  ;;  %v438_v33 = vsub.s32 (!%p332_p10), 1, %v423_v29  ;;  %v454_v39 = vsub.s32 (!%p332_p10), 2, %v423_v29 }
  0x14   : > { %v425_v37 = vrot.slane (!%p332_p10), %v411_v34, %v424_v32  ;;  %v439_v38 = vrot.slane (!%p332_p10), %v411_v34, %v438_v33  ;;  %v455_v44 = vrot.slane (!%p332_p10), %v411_v34, %v454_v39 }
  0x16   : > { %s383_s25 = scalar_select %p382_p11, %s1963_s12, 1 }
  0x18   : > { %s1651_s26 = sshll.u32 %s383_s25, 4  ;;  %s1977_s25 = smov 126  }
  0x19   : > { %s389_s29 = scalar_lea.vmem %s2524_s0, %s1651_s26  ;;  %s2107_s18 = scalar_lea.vmem %s2526_s2, %s1651_s26 }
  0x1a   : > { %v409_v2 = vld [vmem:[%s2107_s18] sm:$0xff]  ;;  %v410_v4 = vld [vmem:[%s2107_s18 + $0x8] sm:$0xff]  ;;  %s395_s16 = scalar_lea.vmem %s2525_s1, %s1651_s26  ;;  %s1983_s26 = smov 96  }
  0x1b   : > { %v2110_v3 = vld [vmem:[%s389_s29] sm:$0xff]  ;;  %1689 = vmatprep.mubr.msk.f32.mxu0 %vm468_vm0, %v409_v2  ;;  %v2115_v5 = vld [vmem:[%s389_s29 + $0x8] sm:$0xff]  ;;  %s1986_s29 = smov 80  }
  0x1c   : > { %616 = vrot.lane.b32.xlu0 %v2110_v3, %s1974_s20  ;;  %1690 = vmatmul.mubr.msk.f32.vlgmr.msra.gmra.mrb[0].mxu0 %vm468_vm0, %v410_v4  ;;  %v408_v6 = vld [vmem:[%s395_s16 + $0x8] sm:$0xff]  ;;  %v407_v7 = vld [vmem:[%s395_s16] sm:$0xff]  ;;  %s1654_s16 = sshll.u32 %s1963_s12, 8  ;;  %s1988_s12 = smov [#allocation4]  }
  0x1d   : > { %620 = vrot.lane.b32.xlu1 %v2110_v3, %s1975_s23  ;;  %v2134_v8 = vpack.c.bf16 %v408_v6, %v407_v7 }
  0x1f   : > { %v577_v10 = vunpack.c.l.bf16 %v2134_v8  ;;  %v578_v11 = vunpack.c.h.bf16 %v2134_v8 }
  0x20   : > { %618 = vrot.lane.b32.xlu0 %v2115_v5, %s1974_s20  ;;  %s1980_s20 = smov 123  }
  0x21   : > { %622 = vrot.lane.b32.xlu1 %v2115_v5, %s1975_s23  ;;  %v579_v13 = vsub.f32 %v407_v7, %v577_v10  ;;  %v580_v14 = vsub.f32 %v408_v6, %v578_v11  ;;  %v2159_v11 = vand.u32 127, %v422_v28 }
  0x23   : > { %v581_v15 = vpack.c.bf16 %v580_v14, %v579_v13  ;;  %v1985_v14 = vmov 0.0  }
  0x24   : > { %596 = vrot.lane.b32.xlu0 %v2110_v3, %s1976_s24 }
  0x25   : > { %598 = vrot.lane.b32.xlu1 %v2115_v5, %s1976_s24  ;;  %s378_s24 = sand.u32 1, %s1955_s10  }
  0x26   : > { %s2478_s23 = scalar_lea.sflag [#allocation5], %s378_s24 }
  0x28   : > { %600 = vrot.lane.b32.xlu0 %v2110_v3, %s1977_s25 }
  0x29   : > { %602 = vrot.lane.b32.xlu1 %v2115_v5, %s1977_s25  ;;  %s1599_s25 = sshll.u32 %s378_s24, 4 }
  0x2c   : > { %604 = vrot.lane.b32.xlu0 %v2110_v3, %s1978_s27 }
  0x2d   : > { %606 = vrot.lane.b32.xlu1 %v2115_v5, %s1978_s27  ;;  %s1897_s27 = sshll.u32 %s1988_s12, 4  ;;  %s1898_s27 = int_to_ptr.vmem [resolvable:$false] %s1897_s27 }
  0x30   : > { %608 = vrot.lane.b32.xlu0 %v2110_v3, %s1979_s28 }
  0x31   : > { %610 = vrot.lane.b32.xlu1 %v2115_v5, %s1979_s28  ;;  %s1984_s28 = smov 48  }
  0x34   : > { %612 = vrot.lane.b32.xlu0 %v2110_v3, %s1980_s20 }
  0x35   : > { %614 = vrot.lane.b32.xlu1 %v2115_v5, %s1980_s20 }
  0x38   : > { %414 = vperm.xlu0 %1854, %v407_v7  }
  0x39   : > { %419 = vperm.xlu1 %1855, %v408_v6  }
  0x3c   : > { %1857 = vset.pattern.permute.xlu0 %v1981_v9 }
  0x3d   : > { %1856 = vset.pattern.permute.xlu1 %v1981_v9  ;;  %433 = vperm.xlu0 %1857, %v408_v6  }
  0x3e   : > { %429 = vperm.xlu1 %1856, %v407_v7  }
  0x41   : > { %1859 = vset.pattern.permute.xlu0 %v1973_v1 }
  0x42   : > { %1858 = vset.pattern.permute.xlu1 %v1982_v12 }
  0x43   : > { %445 = vperm.xlu1 %1858, %v407_v7  }
  0x47   : > { %449 = vperm.xlu1 %1858, %v408_v6  }
  0x4b   : > { %589 = vrot.lane.b32.xlu1 %v581_v15, %s1983_s26 }
  0x4c   : > { %1860 = vset.pattern.permute.xlu1 %v1973_v1 }
  0x8e   : > { %v617_v16 = vpop.permute.xlu0 %616 }
  0x8f   : > { %v621_v17 = vpop.permute.xlu1 %620  ;;  %663 = vperm.xlu0 %1859, %v617_v16  }
  0x92   : > { %v619_v18 = vpop.permute.xlu0 %618 }
  0x93   : > { %666 = vperm.xlu1 %1860, %v619_v18   ;;  %v623_v19 = vpop.permute.xlu1 %622 }
  0x94   : > { %672 = vperm.xlu0 %1859, %v623_v19  }
  0x96   : > { %v597_v20 = vpop.permute.xlu0 %596 }
  0x97   : > { %669 = vperm.xlu1 %1860, %v621_v17   ;;  %v599_v21 = vpop.permute.xlu1 %598 }
  0x9a   : > { %v601_v22 = vpop.permute.xlu0 %600 }
  0x9b   : > { %v2139_v23 = vpop.permute.xlu1 %602 }
  0x9e   : > { %v605_v24 = vpop.permute.xlu0 %604 }
  0x9f   : > { %v2141_v25 = vpop.permute.xlu1 %606 }
  0xa2   : > { %v609_v26 = vpop.permute.xlu0 %608 }
  0xa3   : > { %v2143_v27 = vpop.permute.xlu1 %610 }
  0xa6   : > { %v613_v30 = vpop.permute.xlu0 %612 }
  0xa7   : > { %v2145_v31 = vpop.permute.xlu1 %614 }
  0xb7   : > { %v415_v36 = vpop.permute.xlu0 %414 }
  0xb8   : > { %v420_v35 = vpop.permute.xlu1 %419  ;;  %v426_v43 = vmul.f32 %v425_v37, %v415_v36 }
  0xb9   : > { %v427_v45 = vmul.f32 %v425_v37, %v420_v35 }
  0xbc   : > { %v434_v41 = vpop.permute.xlu0 %433 }
  0xbd   : > { %v430_v40 = vpop.permute.xlu1 %429  ;;  %v441_v46 = vmul.f32 %v439_v38, %v434_v41 }
  0xbe   : > { %v440_v42 = vmul.f32 %v439_v38, %v430_v40 }
  0xbf   : > { %v443_v50 = vadd.f32 %v441_v46, %v427_v45 }
  0xc0   : > { %v442_v48 = vadd.f32 %v440_v42, %v426_v43 }
  0xc2   : > { %v446_v47 = vpop.permute.xlu1 %445 }
  0xc3   : > { %v456_v49 = vmul.f32 %v455_v44, %v446_v47 }
  0xc5   : > { %v458_v52 = vadd.f32 %v456_v49, %v442_v48 }
  0xc6   : > { %v450_v51 = vpop.permute.xlu1 %449 }
  0xc7   : > { %v457_v53 = vmul.f32 %v455_v44, %v450_v51 }
  0xc9   : > { %v459_v54 = vadd.f32 %v457_v53, %v443_v50 }
  0xca   : > { %v590_v12 = vpop.permute.xlu1 %589 }
  0xcb   : > { %v550_v55 = vpack.c.bf16 %v459_v54, %v458_v52 }
  0xcd   : > { %557 = vst.msk [vmem:[#allocation2] sm:$0xff] %vm556_vm1, %v550_v55  ;;  %v552_v56 = vunpack.c.h.bf16 %v550_v55  ;;  %v551_v57 = vunpack.c.l.bf16 %v550_v55 }
  0xcf   : > { %v554_v58 = vsub.f32 %v459_v54, %v552_v56  ;;  %v553_v59 = vsub.f32 %v458_v52, %v551_v57 }
  0xd1   : > { %v555_v60 = vpack.c.bf16 %v554_v58, %v553_v59 }
  0xd3   : > { %558 = vst.msk [vmem:[#allocation3] sm:$0xff] %vm556_vm1, %v555_v60 }
  0xef   : > { %v1691_v62 = vpop.f32.mrb[0].mxu0 }
  0xf0   : > { %v547_v63 = vadd.f32 %v1691_v62, %v1606_v61  ;;  %v541_v0 = vpop.f32.mrb[1].mxu0 }
  0xf1   : > { %v542_v1 = vadd.f32 %v1606_v61, %v541_v0 }
  0xf3   : > { %v559_v2 = vpack.c.bf16 %v547_v63, %v542_v1 }
  0xf5   : > { %v560_v4 = vunpack.c.l.bf16 %v559_v2  ;;  %v561_v6 = vunpack.c.h.bf16 %v559_v2  ;;  %566 = vrot.lane.b32.xlu1 %v559_v2, %s1984_s28 }
  0xf7   : > { %v562_v7 = vsub.f32 %v542_v1, %v560_v4  ;;  %v563_v9 = vsub.f32 %v547_v63, %v561_v6 }
  0xf9   : > { %627 = vperm.xlu1 %1860, %v2110_v3   ;;  %v564_v10 = vpack.c.bf16 %v563_v9, %v562_v7 }
  0xfb   : > { %572 = vrot.lane.b32.xlu0 %v564_v10, %s1984_s28  ;;  %s1899_s28 = scalar_lea.vmem %s1898_s27, 512 }
  0xfd   : > { %633 = vperm.xlu1 %1860, %v597_v20  }
  0xff   : > { %583 = vrot.lane.b32.xlu0 %v2134_v8, %s1983_s26  ;;  %s2476_s26 = scalar_lea.hbm %s2533_s9, %s1654_s16 }
 0x101   : > { %639 = vperm.xlu1 %1860, %v601_v22  }
 0x103   : > { %630 = vperm.xlu0 %1859, %v2115_v5  }
 0x105   : > { %645 = vperm.xlu1 %1860, %v605_v24  }
 0x107   : > { %636 = vperm.xlu0 %1859, %v599_v21  }
 0x109   : > { %651 = vperm.xlu1 %1860, %v609_v26  }
 0x10b   : > { %642 = vperm.xlu0 %1859, %v2139_v23  }
 0x10d   : > { %657 = vperm.xlu1 %1860, %v613_v30  }
 0x10e   : > { %v664_v13 = vpop.permute.xlu0 %663 }
 0x10f   : > { %vm686_vm2 = vcmp.eq.s32.totalorder %v2159_v11, %v664_v13  ;;  %648 = vperm.xlu0 %1859, %v2141_v25  }
 0x110   : > { %v1621_v8 = vsel %vm686_vm2, 1.0, %v1985_v14 }
 0x112   : > { %v667_v3 = vpop.permute.xlu1 %666 }
 0x113   : > { %vm687_vm3 = vcmp.eq.s32.totalorder %v2159_v11, %v667_v3  ;;  %654 = vperm.xlu0 %1859, %v2143_v27   ;;  %v673_v18 = vpop.permute.xlu0 %672 }
 0x114   : > { %v1622_v5 = vsel %vm687_vm3, 1.0, %v1985_v14  ;;  %vm689_vm8 = vcmp.eq.s32.totalorder %v2159_v11, %v673_v18 }
 0x115   : > { %v2168_v15 = vpack.c.bf16 %v1622_v5, %v1621_v8  ;;  %v1624_v22 = vsel %vm689_vm8, 1.0, %v1985_v14 }
 0x116   : > { %v670_v16 = vpop.permute.xlu1 %669 }
 0x117   : > { %1706 = vmatprep.mubr.msk.bf16.mxu1 %vm732_vm4, %v2168_v15  ;;  %660 = vperm.xlu0 %1859, %v2145_v31   ;;  %vm688_vm7 = vcmp.eq.s32.totalorder %v2159_v11, %v670_v16 }
 0x118   : > { %v1623_v21 = vsel %vm688_vm7, 1.0, %v1985_v14 }
 0x119   : > { %v2177_v25 = vpack.c.bf16 %v1624_v22, %v1623_v21 }
 0x167   : > { %v567_v17 = vpop.permute.xlu1 %566 }
 0x168   : > { %570 = vst.msk [vmem:[#allocation2] sm:$0xff] %vm569_vm5, %v567_v17 }
 0x16d   : > { %v573_v19 = vpop.permute.xlu0 %572 }
 0x16e   : > { %575 = vst.msk [vmem:[#allocation3] sm:$0xff] %vm569_vm5, %v573_v19 }
 0x16f   : > { %592 = vst.msk [vmem:[#allocation3] sm:$0xff] %vm586_vm6, %v590_v12 }
 0x171   : > { %v584_v20 = vpop.permute.xlu0 %583 }
 0x172   : > { %587 = vst.msk [vmem:[#allocation2] sm:$0xff] %vm586_vm6, %v584_v20 }
 0x176   : > { %v960_v23 = vld [vmem:[#allocation3] sm:$0xff] }
 0x177   : > { %1692 = vmatprep.subr.bf16.mxu0 %v960_v23  ;;  %1760 = vmatprep.subr.bf16.mxu1 %v960_v23  ;;  %v961_v29 = vunpack.c.l.bf16 %v960_v23  ;;  %v962_v30 = vunpack.c.h.bf16 %v960_v23 }
 0x178   : > { %v628_v24 = vpop.permute.xlu1 %627  ;;  %1693 = vmatpush3.bf16.msra.mxu0 %v960_v23  ;;  %1761 = vmatpush3.bf16.msra.mxu1 %v960_v23 }
 0x179   : > { %v955_v26 = vld [vmem:[#allocation2] sm:$0xff]  ;;  %vm674_vm9 = vcmp.eq.s32.totalorder %v2159_v11, %v628_v24 }
 0x17a   : > { %v956_v27 = vunpack.c.l.bf16 %v955_v26  ;;  %v957_v28 = vunpack.c.h.bf16 %v955_v26  ;;  %1710 = vmatprep.subr.bf16.mxu1 %v955_v26  ;;  %v1609_v36 = vsel %vm674_vm9, 1.0, %v1985_v14 }
 0x17b   : > { %1707 = vmatmul.mubr.msk.bf16.vlgmr.msra.gmra.mrb[0].mxu1 %vm732_vm4, %v2177_v25 }
 0x17c   : > { %v634_v31 = vpop.permute.xlu1 %633  ;;  %1711 = vmatpush3.bf16.msra.mxu1 %v955_v26  ;;  %v2181_v32 = vadd.f32 %v961_v29, %v956_v27  ;;  %v2183_v33 = vadd.f32 %v962_v30, %v957_v28 }
 0x17d   : > { %vm676_vm11 = vcmp.eq.s32.totalorder %v2159_v11, %v634_v31 }
 0x17e   : > { %v1611_v41 = vsel %vm676_vm11, 1.0, %v1985_v14 }
 0x180   : > { %v640_v34 = vpop.permute.xlu1 %639 }
 0x181   : > { %vm678_vm13 = vcmp.eq.s32.totalorder %v2159_v11, %v640_v34 }
 0x182   : > { %v631_v35 = vpop.permute.xlu0 %630  ;;  %v1613_v45 = vsel %vm678_vm13, 1.0, %v1985_v14 }
 0x183   : > { %vm675_vm10 = vcmp.eq.s32.totalorder %v2159_v11, %v631_v35 }
 0x184   : > { %v1610_v37 = vsel %vm675_vm10, 1.0, %v1985_v14  ;;  %v646_v39 = vpop.permute.xlu1 %645 }
 0x185   : > { %v722_v38 = vpack.c.bf16 %v1610_v37, %v1609_v36  ;;  %vm680_vm15 = vcmp.eq.s32.totalorder %v2159_v11, %v646_v39 }
 0x186   : > { %v637_v40 = vpop.permute.xlu0 %636  ;;  %v1615_v50 = vsel %vm680_vm15, 1.0, %v1985_v14 }
 0x187   : > { %vm677_vm12 = vcmp.eq.s32.totalorder %v2159_v11, %v637_v40  ;;  %1694 = vmatprep.mubr.msk.bf16.mxu0 %vm732_vm4, %v722_v38  ;;  %1712 = vmatprep.mubr.msk.bf16.mxu1 %vm732_vm4, %v722_v38 }
 0x188   : > { %v1612_v42 = vsel %vm677_vm12, 1.0, %v1985_v14  ;;  %v652_v46 = vpop.permute.xlu1 %651 }
 0x189   : > { %v723_v43 = vpack.c.bf16 %v1612_v42, %v1611_v41  ;;  %vm682_vm3 = vcmp.eq.s32.totalorder %v2159_v11, %v652_v46 }
 0x18a   : > { %v643_v44 = vpop.permute.xlu0 %642  ;;  %v1617_v55 = vsel %vm682_vm3, 1.0, %v1985_v14 }
 0x18b   : > { %vm679_vm14 = vcmp.eq.s32.totalorder %v2159_v11, %v643_v44  ;;  %1695 = vmatmul.mubr.msk.bf16.vlgmr.msra.gmra.mrb[4].mxu0 %vm732_vm4, %v723_v43  ;;  %1713 = vmatmul.mubr.msk.bf16.vlgmr.msra.gmra.mrb[4].mxu1 %vm732_vm4, %v723_v43 }
 0x18c   : > { %v1614_v47 = vsel %vm679_vm14, 1.0, %v1985_v14  ;;  %v658_v53 = vpop.permute.xlu1 %657 }
 0x18d   : > { %v724_v48 = vpack.c.bf16 %v1614_v47, %v1613_v45  ;;  %vm684_vm6 = vcmp.eq.s32.totalorder %v2159_v11, %v658_v53 }
 0x18e   : > { %v649_v49 = vpop.permute.xlu0 %648  ;;  %v1619_v59 = vsel %vm684_vm6, 1.0, %v1985_v14 }
 0x18f   : > { %vm681_vm2 = vcmp.eq.s32.totalorder %v2159_v11, %v649_v49  ;;  %1698 = vmatprep.mubr.msk.bf16.mxu0 %vm732_vm4, %v724_v48  ;;  %1716 = vmatprep.mubr.msk.bf16.mxu1 %vm732_vm4, %v724_v48 }
 0x190   : > { %v1616_v51 = vsel %vm681_vm2, 1.0, %v1985_v14 }
 0x191   : > { %v725_v52 = vpack.c.bf16 %v1616_v51, %v1615_v50 }
 0x192   : > { %v655_v54 = vpop.permute.xlu0 %654 }
 0x193   : > { %vm683_vm5 = vcmp.eq.s32.totalorder %v2159_v11, %v655_v54  ;;  %1699 = vmatmul.mubr.msk.bf16.gmra.mrb[8].mxu0 %vm732_vm4, %v725_v52  ;;  %1717 = vmatmul.mubr.msk.bf16.gmra.mrb[8].mxu1 %vm732_vm4, %v725_v52 }
 0x194   : > { %v1618_v56 = vsel %vm683_vm5, 1.0, %v1985_v14 }
 0x195   : > { %v726_v57 = vpack.c.bf16 %v1618_v56, %v1617_v55 }
 0x196   : > { %v661_v58 = vpop.permute.xlu0 %660 }
 0x197   : > { %vm685_vm7 = vcmp.eq.s32.totalorder %v2159_v11, %v661_v58  ;;  %1702 = vmatprep.mubr.msk.bf16.mxu0 %vm732_vm4, %v726_v57  ;;  %1720 = vmatprep.mubr.msk.bf16.mxu1 %vm732_vm4, %v726_v57 }
 0x198   : > { %v1620_v60 = vsel %vm685_vm7, 1.0, %v1985_v14 }
 0x199   : > { %v727_v61 = vpack.c.bf16 %v1620_v60, %v1619_v59 }
 0x19b   : > { %1703 = vmatmul.mubr.msk.bf16.gmra.mrb[12].mxu0 %vm732_vm4, %v727_v61  ;;  %1721 = vmatmul.mubr.msk.bf16.gmra.mrb[12].mxu1 %vm732_vm4, %v727_v61 }
 0x19c   : > { %1724 = vmatprep.mubr.msk.bf16.mxu1 %vm732_vm4, %v2168_v15 }
 0x1a3   : > { %1725 = vmatmul.mubr.msk.bf16.gmra.mrb[0].mxu1 %vm732_vm4, %v2177_v25  ;;  %vm1061_vm4 = vcmask 23552  }
 0x25e   : > { %v1696_v62 = vpop.f32.mrb[4].mxu0  ;;  %v1714_v63 = vpop.f32.mrb[4].mxu1 }
 0x25f   : > { %v897_v0 = vadd.f32 %v1714_v63, %v1696_v62  ;;  %v791_v1 = vpop.f32.mrb[5].mxu0  ;;  %v888_v2 = vpop.f32.mrb[5].mxu1 }
 0x260   : > { %v889_v4 = vadd.f32 %v888_v2, %v791_v1  ;;  %v1697_v6 = vpop.f32.mrb[6].mxu0  ;;  %v1715_v7 = vpop.f32.mrb[6].mxu1 }
 0x261   : > { %v2226_v9 = vsub.f32 %v897_v0, %v2181_v32  ;;  %v900_v10 = vadd.f32 %v1715_v7, %v1697_v6  ;;  %v891_v11 = vpop.f32.mrb[7].mxu1  ;;  %1194 = vrot.lane.b32.xlu1 %v897_v0, %s1986_s29  ;;  %v794_v12 = vpop.f32.mrb[7].mxu0 }
 0x262   : > { %v2230_v13 = vsub.f32 %v889_v4, %v2181_v32  ;;  %v892_v3 = vadd.f32 %v891_v11, %v794_v12  ;;  %1190 = vrot.lane.b32.xlu0 %v889_v4, %s1986_s29 }
 0x263   : > { %v2234_v14 = vsub.f32 %v900_v10, %v2183_v33  ;;  %v983_v23 = vmul.f32 %v2226_v9, %v2226_v9 }
 0x264   : > { %v2237_v8 = vsub.f32 %v892_v3, %v2183_v33  ;;  %v981_v19 = vmul.f32 %v2230_v13, %v2230_v13 }
 0x265   : > { %1192 = vrot.lane.b32.xlu1 %v892_v3, %s1986_s29  ;;  %v984_v35 = vmul.f32 %v2234_v14, %v2234_v14 }
 0x266   : > { %1196 = vrot.lane.b32.xlu0 %v900_v10, %s1986_s29  ;;  %v1700_v5 = vpop.f32.mrb[8].mxu0  ;;  %v1718_v15 = vpop.f32.mrb[8].mxu1  ;;  %v982_v31 = vmul.f32 %v2237_v8, %v2237_v8 }
 0x267   : > { %v913_v16 = vadd.f32 %v1718_v15, %v1700_v5  ;;  %v807_v17 = vpop.f32.mrb[9].mxu0  ;;  %v904_v18 = vpop.f32.mrb[9].mxu1 }
 0x268   : > { %v905_v20 = vadd.f32 %v904_v18, %v807_v17  ;;  %v1701_v21 = vpop.f32.mrb[10].mxu0  ;;  %v1719_v22 = vpop.f32.mrb[10].mxu1 }
 0x269   : > { %v2246_v24 = vsub.f32 %v913_v16, %v2181_v32  ;;  %v916_v25 = vadd.f32 %v1719_v22, %v1701_v21  ;;  %1013 = vrot.lane.b32.xlu1 %v981_v19, %s1987_s15  ;;  %v810_v26 = vpop.f32.mrb[11].mxu0  ;;  %v907_v27 = vpop.f32.mrb[11].mxu1 }
 0x26a   : > { %v2250_v28 = vsub.f32 %v905_v20, %v2181_v32  ;;  %v908_v29 = vadd.f32 %v907_v27, %v810_v26  ;;  %1017 = vrot.lane.b32.xlu0 %v983_v23, %s1987_s15 }
 0x26b   : > { %v2254_v30 = vsub.f32 %v916_v25, %v2183_v33  ;;  %v987_v58 = vmul.f32 %v2246_v24, %v2246_v24 }
 0x26c   : > { %v2259_v34 = vsub.f32 %v908_v29, %v2183_v33  ;;  %v985_v55 = vmul.f32 %v2250_v28, %v2250_v28 }
 0x26d   : > { %1015 = vrot.lane.b32.xlu1 %v982_v31, %s1987_s15  ;;  %v988_v62 = vmul.f32 %v2254_v30, %v2254_v30 }
 0x26e   : > { %1019 = vrot.lane.b32.xlu0 %v984_v35, %s1987_s15  ;;  %v1704_v36 = vpop.f32.mrb[12].mxu0  ;;  %v1722_v37 = vpop.f32.mrb[12].mxu1 }
 0x26f   : > { %v929_v38 = vadd.f32 %v1722_v37, %v1704_v36  ;;  %v823_v39 = vpop.f32.mrb[13].mxu0  ;;  %v920_v40 = vpop.f32.mrb[13].mxu1 }
 0x270   : > { %v921_v41 = vadd.f32 %v920_v40, %v823_v39  ;;  %v1705_v42 = vpop.f32.mrb[14].mxu0  ;;  %v1723_v43 = vpop.f32.mrb[14].mxu1 }
 0x271   : > { %v2266_v44 = vsub.f32 %v929_v38, %v2181_v32  ;;  %v932_v45 = vadd.f32 %v1723_v43, %v1705_v42  ;;  %1198 = vrot.lane.b32.xlu1 %v905_v20, %s1986_s29  ;;  %v826_v46 = vpop.f32.mrb[15].mxu0  ;;  %v923_v47 = vpop.f32.mrb[15].mxu1 }
 0x272   : > { %v2270_v48 = vsub.f32 %v921_v41, %v2181_v32  ;;  %v924_v49 = vadd.f32 %v923_v47, %v826_v46  ;;  %1202 = vrot.lane.b32.xlu0 %v913_v16, %s1986_s29 }
 0x273   : > { %v2274_v50 = vsub.f32 %v932_v45, %v2183_v33  ;;  %v991_v0 = vmul.f32 %v2266_v44, %v2266_v44 }
 0x274   : > { %v2277_v51 = vsub.f32 %v924_v49, %v2183_v33  ;;  %v989_v63 = vmul.f32 %v2270_v48, %v2270_v48 }
 0x275   : > { %1200 = vrot.lane.b32.xlu1 %v908_v29, %s1986_s29  ;;  %v992_v1 = vmul.f32 %v2274_v50, %v2274_v50 }
 0x276   : > { %1204 = vrot.lane.b32.xlu0 %v916_v25, %s1986_s29  ;;  %v1726_v52 = vpop.f32.mrb[0].mxu1 }
 0x277   : > { %v2282_v53 = vsub.f32 %v1726_v52, %v2181_v32  ;;  %v936_v54 = vpop.f32.mrb[1].mxu1 }
 0x278   : > { %v2287_v56 = vsub.f32 %v936_v54, %v2181_v32  ;;  %v2289_v57 = vpop.f32.mrb[2].mxu1  ;;  %v986_v32 = vmul.f32 %v2259_v34, %v2259_v34 }
 0x279   : > { %v2295_v59 = vsub.f32 %v2289_v57, %v2183_v33  ;;  %1021 = vrot.lane.b32.xlu1 %v985_v55, %s1987_s15  ;;  %v2298_v60 = vpop.f32.mrb[3].mxu1  ;;  %v995_v4 = vmul.f32 %v2282_v53, %v2282_v53 }
 0x27a   : > { %v2302_v61 = vsub.f32 %v2298_v60, %v2183_v33  ;;  %1025 = vrot.lane.b32.xlu0 %v987_v58, %s1987_s15  ;;  %v990_v33 = vmul.f32 %v2277_v51, %v2277_v51  ;;  %v993_v2 = vmul.f32 %v2287_v56, %v2287_v56 }
 0x27b   : > { %v996_v7 = vmul.f32 %v2295_v59, %v2295_v59 }
 0x27c   : > { %v994_v6 = vmul.f32 %v2302_v61, %v2302_v61 }
 0x27d   : > { %1023 = vrot.lane.b32.xlu1 %v986_v32, %s1987_s15 }
 0x27e   : > { %1027 = vrot.lane.b32.xlu0 %v988_v62, %s1987_s15 }
 0x281   : > { %1029 = vrot.lane.b32.xlu1 %v989_v63, %s1987_s15 }
 0x282   : > { %1033 = vrot.lane.b32.xlu0 %v991_v0, %s1987_s15 }
 0x285   : > { %1031 = vrot.lane.b32.xlu1 %v990_v33, %s1987_s15  ;;  %v1285_v33 = vld [vmem:[%s2532_s8] sm:$0xff] }
 0x286   : > { %1035 = vrot.lane.b32.xlu0 %v992_v1, %s1987_s15  ;;  %v1286_v1 = vld [vmem:[%s2532_s8 + $0x8] sm:$0xff] }
 0x289   : > { %1037 = vrot.lane.b32.xlu1 %v993_v2, %s1987_s15  ;;  %v1748_v2 = vpack.c.bf16 %v1286_v1, %v1285_v33 }
 0x28a   : > { %1041 = vrot.lane.b32.xlu0 %v995_v4, %s1987_s15  ;;  %v1287_v4 = vld [vmem:[%s2532_s8 + $0x10] sm:$0xff] }
 0x28b   : > { %1749 = vmatprep.subr.bf16.mxu0 %v1748_v2 }
 0x28c   : > { %1751 = vmatpush3.bf16.msra.mxu0 %v1748_v2 }
 0x28d   : > { %1039 = vrot.lane.b32.xlu1 %v994_v6, %s1987_s15  ;;  %v1289_v6 = vld [vmem:[%s2532_s8 + $0x20] sm:$0xff] }
 0x28e   : > { %1043 = vrot.lane.b32.xlu0 %v996_v7, %s1987_s15  ;;  %v1290_v7 = vld [vmem:[%s2532_s8 + $0x28] sm:$0xff] }
 0x291   : > { %1206 = vrot.lane.b32.xlu1 %v921_v41, %s1986_s29 }
 0x292   : > { %1210 = vrot.lane.b32.xlu0 %v929_v38, %s1986_s29 }
 0x295   : > { %1208 = vrot.lane.b32.xlu1 %v924_v49, %s1986_s29 }
 0x296   : > { %1212 = vrot.lane.b32.xlu0 %v932_v45, %s1986_s29 }
 0x299   : > { %1214 = vrot.lane.b32.xlu1 %v936_v54, %s1986_s29 }
 0x29a   : > { %1218 = vrot.lane.b32.xlu0 %v1726_v52, %s1986_s29 }
 0x2d3   : > { %v2341_v10 = vpop.permute.xlu1 %1194 }
 0x2d4   : > { %v2343_v11 = vpop.permute.xlu0 %1190 }
 0x2d7   : > { %v2345_v12 = vpop.permute.xlu1 %1192 }
 0x2d8   : > { %v2347_v3 = vpop.permute.xlu0 %1196 }
 0x2db   : > { %v1014_v5 = vpop.permute.xlu1 %1013 }
 0x2dc   : > { %v1018_v15 = vpop.permute.xlu0 %1017  ;;  %v1062_v16 = vsel %vm1061_vm4, %v1014_v5, 0.0  ;;  %v1756_v5 = vpack.c.bf16 %v1290_v7, %v1289_v6 }
 0x2dd   : > { %1063 = vadd.xlane.f32.xlu1 %v1062_v16  ;;  %v1068_v17 = vsel %vm1061_vm4, %v1018_v15, 0.0  ;;  %v2398_v15 = vld [vmem:[%s2529_s5] sm:$0xff] }
 0x2de   : > { %1069 = vadd.xlane.f32.xlu0 %v1068_v17 }
 0x2df   : > { %v1016_v18 = vpop.permute.xlu1 %1015 }
 0x2e0   : > { %v1020_v19 = vpop.permute.xlu0 %1019  ;;  %v1065_v20 = vsel %vm1061_vm4, %v1016_v18, 0.0 }
 0x2e1   : > { %v1071_v21 = vsel %vm1061_vm4, %v1020_v19, 0.0 }
 0x2e2   : > { %1066 = vadd.xlane.f32.xlu0 %v1065_v20  ;;  %1072 = vadd.xlane.f32.xlu1 %v1071_v21 }
 0x2e3   : > { %v2353_v22 = vpop.permute.xlu1 %1198 }
 0x2e4   : > { %v2355_v23 = vpop.permute.xlu0 %1202 }
 0x2e7   : > { %v2357_v25 = vpop.permute.xlu1 %1200 }
 0x2e8   : > { %v2359_v26 = vpop.permute.xlu0 %1204 }
 0x2eb   : > { %v1022_v27 = vpop.permute.xlu1 %1021 }
 0x2ec   : > { %v1026_v29 = vpop.permute.xlu0 %1025  ;;  %v1074_v31 = vsel %vm1061_vm4, %v1022_v27, 0.0 }
 0x2ed   : > { %1075 = vadd.xlane.f32.xlu0 %v1074_v31  ;;  %v1080_v35 = vsel %vm1061_vm4, %v1026_v29, 0.0 }
 0x2ee   : > { %1081 = vadd.xlane.f32.xlu1 %v1080_v35 }
 0x2ef   : > { %v1024_v36 = vpop.permute.xlu1 %1023 }
 0x2f0   : > { %v1028_v37 = vpop.permute.xlu0 %1027  ;;  %v1077_v38 = vsel %vm1061_vm4, %v1024_v36, 0.0 }
 0x2f1   : > { %1078 = vadd.xlane.f32.xlu0 %v1077_v38  ;;  %v1083_v39 = vsel %vm1061_vm4, %v1028_v37, 0.0 }
 0x2f2   : > { %1084 = vadd.xlane.f32.xlu1 %v1083_v39 }
 0x2f3   : > { %v1030_v40 = vpop.permute.xlu1 %1029 }
 0x2f4   : > { %v1034_v41 = vpop.permute.xlu0 %1033  ;;  %v1086_v42 = vsel %vm1061_vm4, %v1030_v40, 0.0 }
 0x2f5   : > { %1087 = vadd.xlane.f32.xlu0 %v1086_v42  ;;  %v1092_v43 = vsel %vm1061_vm4, %v1034_v41, 0.0 }
 0x2f6   : > { %1093 = vadd.xlane.f32.xlu1 %v1092_v43 }
 0x2f7   : > { %v1032_v45 = vpop.permute.xlu1 %1031 }
 0x2f8   : > { %v1036_v46 = vpop.permute.xlu0 %1035  ;;  %v1089_v47 = vsel %vm1061_vm4, %v1032_v45, 0.0 }
 0x2f9   : > { %1090 = vadd.xlane.f32.xlu0 %v1089_v47  ;;  %v1095_v49 = vsel %vm1061_vm4, %v1036_v46, 0.0 }
 0x2fa   : > { %1096 = vadd.xlane.f32.xlu1 %v1095_v49 }
 0x2fb   : > { %v1038_v52 = vpop.permute.xlu1 %1037 }
 0x2fc   : > { %v1042_v54 = vpop.permute.xlu0 %1041  ;;  %v1098_v55 = vsel %vm1061_vm4, %v1038_v52, 0.0 }
 0x2fd   : > { %1099 = vadd.xlane.f32.xlu0 %v1098_v55  ;;  %v1104_v58 = vsel %vm1061_vm4, %v1042_v54, 0.0 }
 0x2fe   : > { %1105 = vadd.xlane.f32.xlu1 %v1104_v58 }
 0x2ff   : > { %v1040_v32 = vpop.permute.xlu1 %1039 }
 0x300   : > { %v1044_v62 = vpop.permute.xlu0 %1043  ;;  %v1101_v63 = vsel %vm1061_vm4, %v1040_v32, 0.0 }
 0x301   : > { %1102 = vadd.xlane.f32.xlu0 %v1101_v63  ;;  %v1107_v0 = vsel %vm1061_vm4, %v1044_v62, 0.0 }
 0x302   : > { %1108 = vadd.xlane.f32.xlu1 %v1107_v0 }
 0x303   : > { %v2401_v16 = vpop.permute.xlu1 %1206 }
 0x304   : > { %v2403_v17 = vpop.permute.xlu0 %1210 }
 0x307   : > { %v2405_v18 = vpop.permute.xlu1 %1208 }
 0x308   : > { %v2407_v19 = vpop.permute.xlu0 %1212 }
 0x30b   : > { %v2409_v20 = vpop.permute.xlu1 %1214 }
 0x30c   : > { %v2411_v21 = vpop.permute.xlu0 %1218 }
 0x313   : > { %1216 = vrot.lane.b32.xlu1 %v2298_v60, %s1986_s29  ;;  %v1288_v60 = vld [vmem:[%s2532_s8 + $0x18] sm:$0xff] }
 0x317   : > { %1220 = vrot.lane.b32.xlu0 %v2289_v57, %s1986_s29  ;;  %v1752_v57 = vpack.c.bf16 %v1288_v60, %v1287_v4  ;;  %s380_s29 = scalar_lea.vmem [#allocation4], %s1599_s25 }
 0x318   : > { %s1485_s15 = sshll.u32 %s380_s29, 4  ;;  %s2471_s15 = int_to_ptr.vmem [resolvable:$true] %s1485_s15 }
 0x319   : > { %1753 = vmatprep.subr.bf16.mxu0 %v1752_v57  ;;  %s1893_s25 = scalar_lea.vmem %s2471_s15, 256  ;;  %p1900_p1 = scmp.lt.s32.totalorder %s2471_s15, %s1898_s27 }
 0x31a   : > { %1755 = vmatpush3.bf16.msra.mxu0 %v1752_v57  ;;  %p1894_p12 = scmp.ne.s32.totalorder %s2471_s15, %s1893_s25  ;;  %p1901_p2 = scmp.lt.s32.totalorder %s1899_s28, %s1893_s25 }
 0x31b   : > { %1757 = vmatprep.subr.bf16.mxu0 %v1756_v5 }
 0x31c   : > { %p1895_p13 = pnand %p1894_p12, %p2081_p4  ;;  %p1902_p3 = por %p1901_p2, %p1900_p1 }
 0x31e   : > { %1759 = vmatpush3.bf16.msra.mxu0 %v1756_v5  ;;  %p1896_p0 = pneg %p1895_p13 }
 0x31f   : > { %1743 = vmatprep.subr.mxu0 %v2398_v15 }
 0x320   : > { %p1903_p5 = pnand %p1902_p3, %p1896_p0 }
 0x36a   : > { %v1064_v27 = vpop.xlane.xlu1 %1063 }
 0x36b   : > { %v1070_v29 = vpop.xlane.xlu0 %1069  ;;  %v1110_v36 = vmax.f32 %v1064_v27, 1e-24 }
 0x36c   : > { %v1112_v37 = vmax.f32 %v1070_v29, 1e-24 }
 0x36d   : > { %1861 = vrsqrt.f32 %v1110_v36 }
 0x36e   : > { %1863 = vrsqrt.f32 %v1112_v37 }
 0x36f   : > { %v1073_v31 = vpop.xlane.xlu1 %1072  ;;  %v1067_v35 = vpop.xlane.xlu0 %1066 }
 0x370   : > { %v1113_v38 = vmax.f32 %v1073_v31, 1e-24  ;;  %v1111_v39 = vmax.f32 %v1067_v35, 1e-24 }
 0x372   : > { %1865 = vrsqrt.f32 %v1113_v38 }
 0x373   : > { %1867 = vrsqrt.f32 %v1111_v39 }
 0x377   : > { %v1862_v32 = vpop.eup %1861 }
 0x378   : > { %v1864_v62 = vpop.eup %1863  ;;  %v1142_v5 = vmul.f32 %v1862_v32, %v2230_v13 }
 0x379   : > { %v1144_v27 = vmul.f32 %v1864_v62, %v2226_v9 }
 0x37a   : > { %v1076_v40 = vpop.xlane.xlu0 %1075 }
 0x37b   : > { %v1114_v41 = vmax.f32 %v1076_v40, 1e-24  ;;  %v1082_v42 = vpop.xlane.xlu1 %1081  ;;  %v1160_v9 = vmax.f32 %v1144_v27, 0.0 }
 0x37c   : > { %v1116_v43 = vmax.f32 %v1082_v42, 1e-24  ;;  %v1866_v0 = vpop.eup %1865 }
 0x37d   : > { %1869 = vrsqrt.f32 %v1114_v41  ;;  %v1868_v2 = vpop.eup %1867  ;;  %v1145_v29 = vmul.f32 %v1866_v0, %v2234_v14 }
 0x37e   : > { %v1079_v45 = vpop.xlane.xlu0 %1078  ;;  %1871 = vrsqrt.f32 %v1116_v43  ;;  %v1143_v39 = vmul.f32 %v1868_v2, %v2237_v8  ;;  %v1158_v43 = vmax.f32 %v1142_v5, 0.0 }
 0x37f   : > { %v1115_v46 = vmax.f32 %v1079_v45, 1e-24  ;;  %v1085_v47 = vpop.xlane.xlu1 %1084 }
 0x380   : > { %v1117_v49 = vmax.f32 %v1085_v47, 1e-24  ;;  %v1238_v62 = vmul.f32 %v2343_v11, %v1158_v43 }
 0x381   : > { %1873 = vrsqrt.f32 %v1115_v46  ;;  %v1161_v46 = vmax.f32 %v1145_v29, 0.0 }
 0x382   : > { %v1088_v52 = vpop.xlane.xlu0 %1087  ;;  %1875 = vrsqrt.f32 %v1117_v49  ;;  %v1255_v5 = vsel %vm556_vm1, %v1238_v62, -inf }
 0x383   : > { %v1118_v54 = vmax.f32 %v1088_v52, 1e-24  ;;  %v1094_v55 = vpop.xlane.xlu1 %1093 }
 0x384   : > { %v1120_v58 = vmax.f32 %v1094_v55, 1e-24 }
 0x385   : > { %1877 = vrsqrt.f32 %v1118_v54 }
 0x386   : > { %1879 = vrsqrt.f32 %v1120_v58  ;;  %v1091_v63 = vpop.xlane.xlu0 %1090 }
 0x387   : > { %v1119_v33 = vmax.f32 %v1091_v63, 1e-24  ;;  %v1097_v1 = vpop.xlane.xlu1 %1096  ;;  %v1870_v60 = vpop.eup %1869 }
 0x388   : > { %v1121_v4 = vmax.f32 %v1097_v1, 1e-24  ;;  %v1872_v57 = vpop.eup %1871  ;;  %v1146_v36 = vmul.f32 %v1870_v60, %v2250_v28 }
 0x389   : > { %1881 = vrsqrt.f32 %v1119_v33  ;;  %v1148_v40 = vmul.f32 %v1872_v57, %v2246_v24  ;;  %v1240_v33 = vmul.f32 %v2341_v10, %v1160_v9 }
 0x38a   : > { %1883 = vrsqrt.f32 %v1121_v4  ;;  %v1100_v6 = vpop.xlane.xlu0 %1099  ;;  %v1162_v49 = vmax.f32 %v1146_v36, 0.0  ;;  %v1241_v4 = vmul.f32 %v2347_v3, %v1161_v46 }
 0x38b   : > { %v1874_v7 = vpop.eup %1873  ;;  %v1122_v31 = vmax.f32 %v1100_v6, 1e-24  ;;  %v1106_v35 = vpop.xlane.xlu1 %1105  ;;  %v1164_v54 = vmax.f32 %v1148_v40, 0.0  ;;  %v1256_v3 = vsel %vm556_vm1, %v1240_v33, -inf }
 0x38c   : > { %v1124_v37 = vmax.f32 %v1106_v35, 1e-24  ;;  %v1876_v38 = vpop.eup %1875  ;;  %v1147_v41 = vmul.f32 %v1874_v7, %v2259_v34  ;;  %v1159_v34 = vmax.f32 %v1143_v39, 0.0 }
 0x38d   : > { %1885 = vrsqrt.f32 %v1122_v31  ;;  %v1149_v28 = vmul.f32 %v1876_v38, %v2254_v30  ;;  %v1242_v30 = vmul.f32 %v2353_v22, %v1162_v49  ;;  %v1244_v2 = vmul.f32 %v2355_v23, %v1164_v54 }
 0x38e   : > { %1887 = vrsqrt.f32 %v1124_v37  ;;  %v1103_v42 = vpop.xlane.xlu0 %1102  ;;  %v1163_v58 = vmax.f32 %v1147_v41, 0.0  ;;  %v1239_v60 = vmul.f32 %v2345_v12, %v1159_v34 }
 0x38f   : > { %v1878_v13 = vpop.eup %1877  ;;  %v1123_v45 = vmax.f32 %v1103_v42, 1e-24  ;;  %v1109_v14 = vpop.xlane.xlu1 %1108  ;;  %v1165_v1 = vmax.f32 %v1149_v28, 0.0  ;;  %v1257_v12 = vsel %vm556_vm1, %v1242_v30, -inf  ;;  %v1259_v29 = vsel %vm556_vm1, %v1244_v2, -inf  ;;  %v1373_v30 = vld [vmem:[%s2107_s18] sm:$0xff] }
 0x390   : > { %v1880_v47 = vpop.eup %1879  ;;  %v1150_v52 = vmul.f32 %v1878_v13, %v2270_v48  ;;  %v1125_v8 = vmax.f32 %v1109_v14, 1e-24  ;;  %v1243_v11 = vmul.f32 %v2357_v25, %v1163_v58  ;;  %v1271_v25 = vsel %vm556_vm1, %v1241_v4, -inf }
 0x391   : > { %v1152_v24 = vmul.f32 %v1880_v47, %v2266_v44  ;;  %1889 = vrsqrt.f32 %v1123_v45  ;;  %v1258_v38 = vmax.f32 %v1255_v5, %v1257_v12  ;;  %v1260_v13 = vmax.f32 %v1256_v3, %v1259_v29 }
 0x392   : > { %v1166_v55 = vmax.f32 %v1150_v52, 0.0  ;;  %1891 = vrsqrt.f32 %v1125_v8  ;;  %v1272_v35 = vsel %vm556_vm1, %v1243_v11, -inf }
 0x393   : > { %v1882_v32 = vpop.eup %1881  ;;  %v1168_v63 = vmax.f32 %v1152_v24, 0.0  ;;  %v1217_v52 = vpop.permute.xlu1 %1216 }
 0x394   : > { %v1884_v0 = vpop.eup %1883  ;;  %v1151_v48 = vmul.f32 %v1882_v32, %v2277_v51  ;;  %v1246_v6 = vmul.f32 %v2401_v16, %v1166_v55  ;;  %v1270_v16 = vsel %vm556_vm1, %v1239_v60, -inf }
 0x395   : > { %v1153_v44 = vmul.f32 %v1884_v0, %v2274_v50  ;;  %v1248_v22 = vmul.f32 %v2403_v17, %v1168_v63  ;;  %v1245_v50 = vmul.f32 %v2359_v26, %v1165_v1  ;;  %v1273_v43 = vmax.f32 %v1270_v16, %v1272_v35  ;;  %v1374_v1 = vld [vmem:[%s2107_s18 + $0x8] sm:$0xff] }
 0x396   : > { %v1167_v57 = vmax.f32 %v1151_v48, 0.0  ;;  %v1643_v48 = vld [vmem:[%s2530_s6] ss:$0 sm:$0xff] }
 0x397   : > { %v1886_v7 = vpop.eup %1885  ;;  %v1169_v10 = vmax.f32 %v1153_v44, 0.0  ;;  %v1274_v40 = vsel %vm556_vm1, %v1245_v50, -inf }
 0x398   : > { %v1888_v51 = vpop.eup %1887  ;;  %v1154_v23 = vmul.f32 %v1886_v7, %v2287_v56  ;;  %v1247_v31 = vmul.f32 %v2405_v18, %v1167_v57  ;;  %v1261_v56 = vsel %vm556_vm1, %v1246_v6, -inf  ;;  %v1275_v8 = vmax.f32 %v1271_v25, %v1274_v40 }
 0x399   : > { %v1156_v27 = vmul.f32 %v1888_v51, %v2282_v53  ;;  %v1249_v37 = vmul.f32 %v2407_v19, %v1169_v10  ;;  %v1263_v53 = vsel %vm556_vm1, %v1248_v22, -inf  ;;  %v1262_v45 = vmax.f32 %v1258_v38, %v1261_v56 }
 0x39a   : > { %v1170_v17 = vmax.f32 %v1154_v23, 0.0  ;;  %v1276_v19 = vsel %vm556_vm1, %v1247_v31, -inf  ;;  %v1264_v46 = vmax.f32 %v1260_v13, %v1263_v53 }
 0x39b   : > { %v1890_v26 = vpop.eup %1889  ;;  %v1172_v36 = vmax.f32 %v1156_v27, 0.0  ;;  %v1278_v28 = vsel %vm556_vm1, %v1249_v37, -inf  ;;  %v1277_v34 = vmax.f32 %v1273_v43, %v1276_v19 }
 0x39c   : > { %v1892_v39 = vpop.eup %1891  ;;  %v1155_v41 = vmul.f32 %v1890_v26, %v2302_v61  ;;  %v1250_v42 = vmul.f32 %v2409_v20, %v1170_v17  ;;  %v1279_v55 = vmax.f32 %v1275_v8, %v1278_v28 }
 0x39d   : > { %v1157_v18 = vmul.f32 %v1892_v39, %v2295_v59  ;;  %v1252_v9 = vmul.f32 %v2411_v21, %v1172_v36  ;;  %v1221_v59 = vpop.permute.xlu0 %1220 }
 0x39e   : > { %v1171_v14 = vmax.f32 %v1155_v41, 0.0  ;;  %v1265_v47 = vsel %vm556_vm1, %v1250_v42, -inf }
 0x39f   : > { %v1173_v49 = vmax.f32 %v1157_v18, 0.0  ;;  %v1266_v61 = vmax.f32 %v1262_v45, %v1265_v47  ;;  %v1267_v20 = vsel %vm556_vm1, %v1252_v9, -inf }
 0x3a0   : > { %v1251_v54 = vmul.f32 %v1217_v52, %v1171_v14  ;;  %v1268_v21 = vmax.f32 %v1264_v46, %v1267_v20 }
 0x3a1   : > { %v1253_v24 = vmul.f32 %v1221_v59, %v1173_v49 }
 0x3a2   : > { %v1280_v58 = vsel %vm556_vm1, %v1251_v54, -inf  ;;  %v1269_v32 = vmax.f32 %v1266_v61, %v1268_v21 }
 0x3a3   : > { %v1282_v62 = vsel %vm556_vm1, %v1253_v24, -inf  ;;  %v1281_v63 = vmax.f32 %v1277_v34, %v1280_v58 }
 0x3a4   : > { %v1283_v0 = vmax.f32 %v1279_v55, %v1282_v62  ;;  %1740 = vmatprep.mubr.msk.f32.mxu0 %vm556_vm1, %v1269_v32 }
 0x3a6   : > { %v1284_v33 = vmax.f32 %v1281_v63, %v1283_v0 }
 0x3a8   : > { %1741 = vmatmul.mubr.msk.f32.vlgmr.msra.gmra.mrb[2].mxu0 %vm556_vm1, %v1284_v33 }
 0x3a9   : > { %1744 = vmatpush3.msra.mxu0 %v2398_v15  ;;  %1745 = vmatprep.mubr.msk.f32.mxu0 %vm468_vm0, %v1373_v30 }
 0x3b0   : > { %1746 = vmatmul.mubr.msk.f32.vlgmr.msra.gmra.mrb[2].mxu0 %vm468_vm0, %v1374_v1 }
 0x483   : > { %v1747_v2 = vpop.f32.mrb[2].mxu0 }
 0x484   : > { %v1462_v44 = vadd.f32 %v1747_v2, %v1643_v48  ;;  %v1456_v15 = vpop.f32.mrb[3].mxu0 }
 0x485   : > { %v1457_v4 = vadd.f32 %v1643_v48, %v1456_v15 }
 0x486   : > { %1468 = vst [vmem:[%s380_s29 + $0x8] sm:$0xff] %v1462_v44 }
 0x487   : > { %1467 = vst [vmem:[%s380_s29] sm:$0xff] %v1457_v4 }
 0x488   : > { %1906 = shalt.err (!%p1903_p5)
}
 0x489   : > { %s1907_s24 = scalar_lea.hbm %s2476_s26, 256  ;;  %s1911_s18 = scalar_lea.hbm %s2533_s9, 512 }
 0x48a   : > { %p1908_p6 = scmp.ne.s32.totalorder %s2476_s26, %s1907_s24  ;;  %p1912_p10 = scmp.lt.u32.totalorder %s2476_s26, %s2533_s9 }
 0x48b   : > { %p1913_p11 = scmp.lt.u32.totalorder %s1911_s18, %s1907_s24  ;;  %p1915_p13 = scmp.lt.u32.totalorder %s1907_s24, %s2476_s26 }
 0x48c   : > { %p1909_p7 = pnand %p1908_p6, %p2081_p4 }
 0x48d   : > { %p1914_p12 = por %p1913_p11, %p1912_p10 }
 0x48e   : > { %p1910_p9 = pneg %p1909_p7 }
 0x48f   : > { %p1916_p0 = por %p1915_p13, %p1914_p12 }
 0x491   : > { %p1917_p1 = pnand %p1916_p0, %p1910_p9 }
 0x493   : > { %1920 = shalt.err (!%p1917_p1)
}
 0x494   : > { %s1989_s25 = smov 128   ;;  %s1990_s27 = smov 8  }
 0x495   : > { %1782 = dma.vmem_to_hbm [thread:$0]  (%p2081_p4), %s2471_s15, 256, %s2476_s26, %s2478_s23, %s1989_s25, %s1989_s25, %s1990_s27  }
 0x496 PF: > { %p1788_p2 = scmp.ge.s32.totalorder %s1971_s14, 2  ;;  %s1500_s28 = sand.u32 1, %s1951_s30  }
 0x497   : > { %s1501_s24 = scalar_lea.sflag [#allocation5], %s1500_s28 }
 0x498   : > { %p1785_p3 = pnand %p1788_p2, %p2088_p8 }
 0x49a   : > { %1946 = dma.done.wait (!%p1785_p3), %s1501_s24, 256  }
 0x49b   : > { %1948 = vsyncadd (!%p1785_p3), %s1501_s24, 4294967040  ;;  %s22_s14 = sadd.s32 1, %s1971_s14   ;;  %s2536_s30 = smov %s1955_s10 }
 0x49c   : > { %p19_p5 = scmp.ge.s32.totalorder %s22_s14, 4   ;;  %s2537_s10 = smov %s1959_s11 }
 0x49d   : > { %s2538_s11 = smov %s2094_s22  ;;  %s2539_s12 = smov %s1967_s13 }
 0x49e   : > { %s2540_s13 = smov %s2542_s17  ;;  %21 = sbr.rel (!%p19_p5) target bundleno = 4 (0x4), region = 104 }
 0x4a5   :  { %1506 = vsyncpa [#allocation5], 1 }
 0x4a6   :  { %1508 = vsyncpa [#allocation5 + $0x1], 1 }

</bundles_post_ra>
